<compile_context>
chip_gen: v6e
topology: v6e:2x2x1
jax: 0.10.0
libtpu: 0.0.40
codegen_flags: <defaults>
</compile_context>

<pallas_src>
import jax
import jax.numpy as jnp
from jax import lax
from jax.experimental import pallas as pl
from jax.experimental.pallas import tpu as pltpu

_LANE = 128
_SUBLANE = 8
_VPU_MAX_O = 32  # below this, the VPU path beats a skinny (O << 128 lanes) MXU matmul


def _round_up(x: int, m: int) -> int:
    return ((x + m - 1) // m) * m


def _baseline_vpu_kernel(h_ref, w_ref, b_ref, o_ref):
    """Small-O path: batch on the lane axis, H reduction on sublanes (no MXU).

    h_ref: (Hpad, Npad) VMEM  -- hidden state, transposed (batch on lanes)
    w_ref: (Hpad, O)    VMEM  -- weight in (input, output) layout
    b_ref: (O,)         SMEM  -- bias scalars
    o_ref: (O, Npad)    VMEM  -- lane-dense output (unmasked stores)
    """
    h = h_ref[...].astype(jnp.float32)
    w = w_ref[...].astype(jnp.float32)
    for o in range(o_ref.shape[0]):                       # O is small & static: unrolled
        col = lax.slice_in_dim(w, o, o + 1, axis=1)       # (Hpad, 1), lane-broadcast
        acc = jnp.sum(h * col, axis=0, keepdims=True)     # sublane reduce -> (1, Npad)
        o_ref[o:o + 1, :] = (acc + b_ref[o]).astype(o_ref.dtype)


def _baseline_mxu_kernel(h_ref, wt_ref, b_ref, o_ref):
    """General path: MXU-native NN matmul with pre-transposed weight.

    h_ref: (N, H), wt_ref: (H, O), b_ref: (1, O), o_ref: (N, O)
    """
    # TODO(synk): for large H/O on v6e/v7x, cast operands to bf16 here (keep
    # preferred_element_type=f32) to hit the bf16 MXU peak.
    acc = jnp.dot(h_ref[...], wt_ref[...], preferred_element_type=jnp.float32)
    o_ref[...] = (acc + b_ref[...]).astype(o_ref.dtype)


def signal_baseline_forward(h_t: jax.Array, weight_t: jax.Array, bias: jax.Array) -> jax.Array:
    """Pallas equivalent of SignalBaseline.forward.

    h_t      : (B, input_size)
    weight_t : (input_size, output_size)  -- pre-transposed ONCE at init
    bias     : (output_size,)
    returns  : (B, output_size)
    """
    h_t = lax.stop_gradient(h_t)            # .detach() forward/grad semantics
    N, H = h_t.shape
    Hw, O = weight_t.shape
    assert Hw == H, "weight_t must be (input_size, output_size)"

    vmem = pl.BlockSpec(memory_space=pltpu.MemorySpace.VMEM)
    smem = pl.BlockSpec(memory_space=pltpu.MemorySpace.SMEM)

    if O < _VPU_MAX_O:
        # Batch-on-lanes layout: pad N to the lane width, H to the sublane width.
        Npad = _round_up(max(N, _LANE), _LANE)
        Hpad = _round_up(H, _SUBLANE)
        h_T = jnp.pad(jnp.transpose(h_t), ((0, Hpad - H), (0, Npad - N)))
        w_p = jnp.pad(weight_t, ((0, Hpad - H), (0, 0)))
        out = pl.pallas_call(
            _baseline_vpu_kernel,
            out_shape=jax.ShapeDtypeStruct((O, Npad), h_t.dtype),
            in_specs=[vmem, vmem, smem],
            out_specs=vmem,
        )(h_T, w_p, bias)
        return jnp.transpose(out[:, :N])    # (B, O); cheap for tiny O
    else:
        out = pl.pallas_call(
            _baseline_mxu_kernel,
            out_shape=jax.ShapeDtypeStruct((N, O), h_t.dtype),
            in_specs=[vmem, vmem, vmem],
            out_specs=vmem,
        )(h_t, weight_t, bias.reshape(1, O))
        return out


def signal_baseline_forward_timebatched(h_seq: jax.Array, weight_t: jax.Array,
                                        bias: jax.Array) -> jax.Array:
    """One kernel call for all T timesteps: (T, B, H) -> (T, B, O)."""
    T, B, H = h_seq.shape
    O = weight_t.shape[1]
    out = signal_baseline_forward(h_seq.reshape(T * B, H), weight_t, bias)
    return out.reshape(T, B, O)


def init_signal_baseline_params(key, input_size: int, output_size: int):
    """nn.Linear default init (uniform +/- 1/sqrt(fan_in)).

    Weight is returned PRE-TRANSPOSED as (input_size, output_size) so no
    per-call transpose is ever needed.
    """
    k_w, k_b = jax.random.split(key)
    bound = 1.0 / (input_size ** 0.5)
    weight_t = jax.random.uniform(k_w, (input_size, output_size),
                                  dtype=jnp.float32, minval=-bound, maxval=bound)
    bias = jax.random.uniform(k_b, (output_size,),
                              dtype=jnp.float32, minval=-bound, maxval=bound)
    return weight_t, bias


if __name__ == "__main__":
    B, input_size, output_size = 8, 32, 1
    T = 6

    key = jax.random.PRNGKey(0)
    k_h, k_seq, k_p, k_p2 = jax.random.split(key, 4)
    h_t = jax.random.normal(k_h, (B, input_size), dtype=jnp.float32)
    h_seq = jax.random.normal(k_seq, (T, B, input_size), dtype=jnp.float32)
    weight_t, bias = init_signal_baseline_params(k_p, input_size, output_size)

    # O == 1 (module's actual use): VPU batch-on-lanes path.
    b_t = signal_baseline_forward(h_t, weight_t, bias)
    jax.block_until_ready(b_t)
    ref = h_t @ weight_t + bias
    assert b_t.shape == (B, output_size)
    assert jnp.allclose(b_t, ref, atol=1e-5, rtol=1e-5)

    # Time-batched variant: one kernel call for all T timesteps.
    b_seq = signal_baseline_forward_timebatched(h_seq, weight_t, bias)
    jax.block_until_ready(b_seq)
    ref_seq = h_seq @ weight_t + bias
    assert b_seq.shape == (T, B, output_size)
    assert jnp.allclose(b_seq, ref_seq, atol=1e-5, rtol=1e-5)

    # Small O > 1 still uses the VPU path.
    w4, bia4 = init_signal_baseline_params(k_p2, input_size, 4)
    out4 = signal_baseline_forward(h_t, w4, bia4)
    jax.block_until_ready(out4)
    assert jnp.allclose(out4, h_t @ w4 + bia4, atol=1e-5, rtol=1e-5)

    # General large-O path (MXU-native NN matmul, weight already (H, O)).
    w64, bia64 = init_signal_baseline_params(jax.random.PRNGKey(7), input_size, 64)
    out64 = signal_baseline_forward(h_t, w64, bia64)
    jax.block_until_ready(out64)
    assert jnp.allclose(out64, h_t @ w64 + bia64, atol=1e-5, rtol=1e-5)

    print("KERNEL_OK")
</pallas_src>

<mosaic_0001>
module attributes {stable_mosaic.version = 11 : i64} {
  func.func @_baseline_vpu_kernel(%arg0: memref<32x128xf32, #tpu.memory_space<vmem>>, %arg1: memref<32x1xf32, #tpu.memory_space<vmem>>, %arg2: memref<1xf32, #tpu.memory_space<smem>>, %arg3: memref<1x128xf32, #tpu.memory_space<vmem>>) attributes {dimension_semantics = [], scalar_prefetch = 0 : i64, scratch_operands = 0 : i64, tpu.core_type = #tpu.core_type<tc>} {
    %c0 = arith.constant 0 : index
    %c0_0 = arith.constant 0 : index
    %0 = vector.load %arg0[%c0, %c0_0] : memref<32x128xf32, #tpu.memory_space<vmem>>, vector<32x128xf32>
    %c0_1 = arith.constant 0 : index
    %c0_2 = arith.constant 0 : index
    %1 = vector.load %arg1[%c0_1, %c0_2] : memref<32x1xf32, #tpu.memory_space<vmem>>, vector<32x1xf32>
    %2 = vector.extract_strided_slice %1 {offsets = [0, 0], sizes = [32, 1], strides = [1, 1]} : vector<32x1xf32> to vector<32x1xf32>
    %3 = vector.broadcast %2 : vector<32x1xf32> to vector<32x128xf32>
    %4 = arith.mulf %0, %3 : vector<32x128xf32>
    %cst = arith.constant dense<0.000000e+00> : vector<128xf32>
    %5 = vector.multi_reduction <add>, %4, %cst [0] : vector<32x128xf32> to vector<128xf32>
    %6 = vector.shape_cast %5 : vector<128xf32> to vector<1x128xf32>
    %c0_3 = arith.constant 0 : index
    %7 = memref.load %arg2[%c0_3] : memref<1xf32, #tpu.memory_space<smem>>
    %8 = vector.broadcast %7 : f32 to vector<1x128xf32>
    %9 = arith.addf %6, %8 : vector<1x128xf32>
    %c0_4 = arith.constant 0 : index
    %c0_5 = arith.constant 0 : index
    %10 = vector.load %arg3[%c0_4, %c0_5] : memref<1x128xf32, #tpu.memory_space<vmem>>, vector<1x128xf32>
    tpu.vector_store %arg3[%c0_4, %c0_5], %9 {strides = array<i32>} : memref<1x128xf32, #tpu.memory_space<vmem>>, vector<1x128xf32>,
    return
  }
}

</mosaic_0001>

<bundles_post_ra>
// kernel: tpu_custom_call.1
= control target key start
LH: loop header
LB: loop body
LE: loop exit
PB: predicated region body
PF: predicated region fallthrough
CT: control target
= control target key end

     0   :  { %v101_v2 = vmov 0   ;;  %s153_s0 = inlined_call_operand.vmem [shape: f32[32,128], index: 0, kind: input, shape index: {}]   ;;  %s154_s1 = inlined_call_operand.vmem [shape: f32[32,1], index: 1, kind: input, shape index: {}]   ;;  %s155_s2 = inlined_call_operand.<no memory space> [shape: f32[1], index: 2, kind: input, shape index: {}]   ;;  %s156_s3 = inlined_call_operand.hbm [shape: f32[1,128], index: 3, kind: output, shape index: {}]  }
   0x1   :  { %v22_v0 = vld [vmem:[%s154_s1 + $0x10] sm:$0xff]  ;;  %v20_v1 = vld [vmem:[%s154_s1] sm:$0xff]  ;;  %78 = vset.pattern.permute.xlu1 %v101_v2  ;;  %77 = vset.pattern.permute.xlu0 %v101_v2 }
   0x2   :  { %36 = vperm.xlu1 %78, %v22_v0   ;;  %26 = vperm.xlu0 %77, %v20_v1  }
   0x3   :  { %9 = vsyncpa [#allocation4], 0  ;;  %v23_v3 = vld [vmem:[%s154_s1 + $0x18] sm:$0xff]  ;;  %v21_v4 = vld [vmem:[%s154_s1 + $0x8] sm:$0xff]  ;;  %v58_v25 = vstv %s155_s2  ;;  %s102_s29 = smov [#allocation3]  }
   0x4   :  { %v16_v7 = vld [vmem:[%s153_s0] sm:$0xff]  ;;  %v17_v8 = vld [vmem:[%s153_s0 + $0x8] sm:$0xff]  ;;  %v18_v9 = vld [vmem:[%s153_s0 + $0x10] sm:$0xff]  ;;  %s67_s30 = sshll.u32 %s102_s29, 4  ;;  %s68_s30 = int_to_ptr.vmem [resolvable:$true] %s67_s30 }
   0x5   :  { %v19_v14 = vld [vmem:[%s153_s0 + $0x18] sm:$0xff]  ;;  %s79_s0 = scalar_lea.vmem %s68_s30, 16  ;;  %s83_s4 = scalar_lea.vmem %s68_s30, 32 }
   0x6   :  { %41 = vperm.xlu1 %78, %v23_v3   ;;  %31 = vperm.xlu0 %77, %v21_v4   ;;  %p80_p0 = scmp.ne.s32.totalorder %s68_s30, %s79_s0  ;;  %p84_p1 = scmp.lt.s32.totalorder %s68_s30, %s68_s30 }
   0x7   :  { %p85_p2 = scmp.lt.s32.totalorder %s83_s4, %s79_s0 }
   0x9   :  { %p86_p3 = por %p85_p2, %p84_p1 }
   0xb   :  { %p87_p4 = pnand %p86_p3, %p80_p0 }
  0x7d   :  { %v37_v5 = vpop.permute.xlu1 %36  ;;  %v27_v6 = vpop.permute.xlu0 %26 }
  0x7e   :  { %v44_v11 = vmul.f32 %v27_v6, %v16_v7  ;;  %v46_v15 = vmul.f32 %v37_v5, %v18_v9 }
  0x81   :  { %v32_v10 = vpop.permute.xlu0 %31  ;;  %v42_v13 = vpop.permute.xlu1 %41 }
  0x82   :  { %v45_v12 = vmul.f32 %v32_v10, %v17_v8  ;;  %v47_v17 = vmul.f32 %v42_v13, %v19_v14 }
  0x84   :  { %v48_v16 = vadd.f32 %v45_v12, %v44_v11 }
  0x86   :  { %v49_v18 = vadd.f32 %v48_v16, %v46_v15 }
  0x88   :  { %v50_v19 = vadd.f32 %v49_v18, %v47_v17 }
  0x8a   :  { %v51_v20 = vrot.slane %v50_v19, 4 }
  0x8c   :  { %v52_v21 = vadd.f32 %v51_v20, %v50_v19 }
  0x8e   :  { %v53_v22 = vrot.slane %v52_v21, 2 }
  0x90   :  { %v54_v23 = vadd.f32 %v53_v22, %v52_v21 }
  0x92   :  { %v55_v24 = vrot.slane %v54_v23, 1 }
  0x94   :  { %v56_v26 = vadd.f32 %v55_v24, %v54_v23 }
  0x96   :  { %v59_v27 = vadd.f32 %v58_v25, %v56_v26 }
  0x98   :  { %60 = vst [vmem:[#allocation3] sm:$0x1] %v59_v27 }
  0x99   :  { %90 = shalt.err (!%p87_p4)
}
  0x9a   :  { %70 = dma.vmem_to_hbm [thread:$0]  %s68_s30, 16, %s156_s3, [#allocation4]  }
  0x9b   :  { %99 = dma.done.wait [#allocation4], 16  }
  0x9c   :  { %100 = vsyncadd [#allocation4], 4294967280 }
  0x9d   :  { %74 = vsyncpa [#allocation4], 1 }

</bundles_post_ra>
